<compile_context>
chip_gen: v5e
topology: v5e:2x2
jax: 0.10.0
libtpu: 0.0.40
codegen_flags: <defaults>
</compile_context>

<pallas_src>
import functools

import jax
import jax.numpy as jnp
from jax.experimental import pallas as pl
from jax.experimental.pallas import tpu as pltpu

BN_EPS = 1e-5
LANE = 128
SUBLANE = 8
MAX_B_TILE = 1024  # rows per grid step (multiple of 8)


def _round_up(x, m):
    return (x + m - 1) // m * m


def _cdiv(a, b):
    return (a + b - 1) // b


# --------------------------------------------------------------------------- #
# Fused kernel: BN batch-stats (step 0) + BN affine + fc1..fc4 (every step).
# x is a single VMEM-resident block covering the whole (padded) batch.
# --------------------------------------------------------------------------- #
def _actor_kernel(x_ref, gamma_ref, beta_ref,
                  w1_ref, b1_ref, w2_ref, b2_ref,
                  w3_ref, b3_ref, w4_ref, b4_ref,
                  o_ref, scale_sc, shift_sc, *, n_rows, b_tile):
    i = pl.program_id(0)

    @pl.when(i == 0)
    def _():
        # Two-pass mean/var (no E[x^2]-mean^2 cancellation); padded rows masked.
        x_all = x_ref[...]                                        # (B_pad, S) f32
        inv_n = jnp.float32(1.0 / n_rows)
        mean = jnp.sum(x_all, axis=0, keepdims=True) * inv_n      # pad rows are zero
        rows = jax.lax.broadcasted_iota(jnp.int32, x_all.shape, 0)
        d = jnp.where(rows < n_rows, x_all - mean, 0.0)
        var = jnp.sum(d * d, axis=0, keepdims=True) * inv_n
        scale = gamma_ref[...] * jax.lax.rsqrt(var + BN_EPS)      # fused gamma*rsqrt
        scale_sc[...] = scale
        shift_sc[...] = beta_ref[...] - mean * scale

    start = pl.multiple_of(i * b_tile, SUBLANE)
    xs = x_ref[pl.ds(start, b_tile), :]                           # slice resident x
    h = xs * scale_sc[...] + shift_sc[...]                        # f32 fma (VPU)

    def dense(h, w_ref, b_ref):
        return jnp.dot(h.astype(w_ref.dtype), w_ref[...],
                       preferred_element_type=jnp.float32) + b_ref[...]

    h = jnp.maximum(dense(h, w1_ref, b1_ref), 0.0)
    h = jnp.maximum(dense(h, w2_ref, b2_ref), 0.0)
    h = jnp.maximum(dense(h, w3_ref, b3_ref), 0.0)
    o_ref[...] = jnp.tanh(dense(h, w4_ref, b4_ref))               # (b_tile, A)


# --------------------------------------------------------------------------- #
# Host-side wrapper
# --------------------------------------------------------------------------- #
def actor_forward(state, kparams, action_size):
    """state: (B, state_size) float32.  kparams: prepared params (see
    pad_params_for_kernel).  Returns (B, action_size) float32 actions."""
    B, S = state.shape
    assert kparams["gamma"].shape == (1, S)
    assert kparams["w4"].shape[1] == action_size

    # Balanced batch tile: last tile is never mostly padding.
    b_tile = _round_up(_cdiv(B, _cdiv(B, MAX_B_TILE)), SUBLANE)
    nb = _cdiv(B, b_tile)
    B_pad = nb * b_tile

    x = state.astype(jnp.float32)
    if B_pad != B:
        x = jnp.zeros((B_pad, S), jnp.float32).at[:B].set(x)

    def const_map(i):
        return (0, 0)

    param_names = ("w1", "b1", "w2", "b2", "w3", "b3", "w4", "b4")
    param_specs = [pl.BlockSpec(kparams[n].shape, const_map) for n in param_names]

    out = pl.pallas_call(
        functools.partial(_actor_kernel, n_rows=B, b_tile=b_tile),
        out_shape=jax.ShapeDtypeStruct((B_pad, action_size), jnp.float32),
        grid=(nb,),
        in_specs=[pl.BlockSpec((B_pad, S), const_map),   # x: whole array, VMEM-resident
                  pl.BlockSpec((1, S), const_map),       # gamma
                  pl.BlockSpec((1, S), const_map)]       # beta
                 + param_specs,                          # weights/biases, resident
        out_specs=pl.BlockSpec((b_tile, action_size), lambda i: (i, 0)),
        scratch_shapes=[pltpu.VMEM((1, S), jnp.float32),   # BN scale
                        pltpu.VMEM((1, S), jnp.float32)],  # BN shift
        compiler_params=pltpu.CompilerParams(
            dimension_semantics=("arbitrary",)),           # steps depend on step-0 stats
    )(x, kparams["gamma"], kparams["beta"], *[kparams[n] for n in param_names])

    return out if B_pad == B else out[:B]


# --------------------------------------------------------------------------- #
# Parameter construction
# --------------------------------------------------------------------------- #
def init_actor_params(key, state_size, action_size, layer_sizes=(32, 64, 64)):
    """Unpadded f32 params mimicking PyTorch defaults:
       Linear: U(-1/sqrt(fan_in), 1/sqrt(fan_in)) for W and b (W stored (in, out)).
       BatchNorm1d: gamma=1, beta=0."""
    dims = [state_size, layer_sizes[0], layer_sizes[1], layer_sizes[2], action_size]
    params = {
        "gamma": jnp.ones((1, state_size), jnp.float32),
        "beta": jnp.zeros((1, state_size), jnp.float32),
    }
    for i in range(4):
        fan_in, fan_out = dims[i], dims[i + 1]
        key, kw, kb = jax.random.split(key, 3)
        bound = 1.0 / float(fan_in) ** 0.5
        params[f"w{i+1}"] = jax.random.uniform(
            kw, (fan_in, fan_out), jnp.float32, -bound, bound)
        params[f"b{i+1}"] = jax.random.uniform(
            kb, (1, fan_out), jnp.float32, -bound, bound)
    return params


def pad_params_for_kernel(params, weight_dtype=jnp.bfloat16):
    """Prepare params for the kernel:
       * state dim (K of fc1) and action dim (N of fc4) are NOT padded
         (keeps x/output HBM traffic minimal; Mosaic pads internally).
       * hidden dims are zero-padded to 128 lanes (MXU-aligned, weights are
         VMEM-resident so the cost is negligible).
       * matmul weights are cast to bf16; biases / gamma / beta stay f32."""
    def pad2d(a, rows, cols, dtype):
        out = jnp.zeros((rows, cols), dtype)
        return out.at[:a.shape[0], :a.shape[1]].set(a.astype(dtype))

    S = params["gamma"].shape[1]
    A = params["w4"].shape[1]
    k = {
        "gamma": params["gamma"].astype(jnp.float32),
        "beta": params["beta"].astype(jnp.float32),
    }
    in_dim = S
    for i in range(1, 5):
        w, b = params[f"w{i}"], params[f"b{i}"]
        out_dim = A if i == 4 else _round_up(w.shape[1], LANE)
        k[f"w{i}"] = pad2d(w, in_dim, out_dim, weight_dtype)
        k[f"b{i}"] = pad2d(b, 1, out_dim, jnp.float32)
        in_dim = out_dim
    return k


# --------------------------------------------------------------------------- #
# Pure-JAX reference (f32, unpadded) for sanity checking
# --------------------------------------------------------------------------- #
def actor_reference(state, params):
    x = state.astype(jnp.float32)
    mean = jnp.mean(x, axis=0, keepdims=True)
    var = jnp.mean((x - mean) ** 2, axis=0, keepdims=True)
    h = (x - mean) / jnp.sqrt(var + BN_EPS) * params["gamma"] + params["beta"]
    h = jnp.maximum(h @ params["w1"] + params["b1"], 0.0)
    h = jnp.maximum(h @ params["w2"] + params["b2"], 0.0)
    h = jnp.maximum(h @ params["w3"] + params["b3"], 0.0)
    return jnp.tanh(h @ params["w4"] + params["b4"])


if __name__ == "__main__":
    key = jax.random.PRNGKey(0)
    B, state_size, action_size = 8, 16, 4

    key, k_state, k_params = jax.random.split(key, 3)
    state = jax.random.normal(k_state, (B, state_size), jnp.float32)
    params = init_actor_params(k_params, state_size, action_size)
    kparams = pad_params_for_kernel(params)

    out = actor_forward(state, kparams, action_size)
    out = jax.block_until_ready(out)

    ref = actor_reference(state, params)
    assert out.shape == (B, action_size)
    # bf16 matmul operands (f32 accumulation) -> loosened tolerance vs f32 ref.
    assert jnp.allclose(out, ref, atol=2e-2, rtol=2e-2), (out, ref)
    print("KERNEL_OK")
</pallas_src>

<mosaic_0001>
module attributes {stable_mosaic.version = 11 : i64} {
  func.func @_actor_kernel(%arg0: i32, %arg1: memref<8x16xf32, #tpu.memory_space<vmem>>, %arg2: memref<1x16xf32, #tpu.memory_space<vmem>>, %arg3: memref<1x16xf32, #tpu.memory_space<vmem>>, %arg4: memref<16x128xbf16, #tpu.memory_space<vmem>>, %arg5: memref<1x128xf32, #tpu.memory_space<vmem>>, %arg6: memref<128x128xbf16, #tpu.memory_space<vmem>>, %arg7: memref<1x128xf32, #tpu.memory_space<vmem>>, %arg8: memref<128x128xbf16, #tpu.memory_space<vmem>>, %arg9: memref<1x128xf32, #tpu.memory_space<vmem>>, %arg10: memref<128x4xbf16, #tpu.memory_space<vmem>>, %arg11: memref<1x4xf32, #tpu.memory_space<vmem>>, %arg12: memref<8x4xf32, #tpu.memory_space<vmem>>, %arg13: memref<1x16xf32, #tpu.memory_space<vmem>>, %arg14: memref<1x16xf32, #tpu.memory_space<vmem>>) attributes {dimension_semantics = [#tpu.dimension_semantics<arbitrary>], iteration_bounds = array<i64: 1>, scalar_prefetch = 0 : i64, scratch_operands = 2 : i64, tpu.core_type = #tpu.core_type<tc>, window_params = [{pipeline_mode = #tpu.pipeline_mode<synchronous>, transform_indices = @transform_0, window_bounds = array<i64: 8, 16>}, {pipeline_mode = #tpu.pipeline_mode<synchronous>, transform_indices = @transform_1, window_bounds = array<i64: 1, 16>}, {pipeline_mode = #tpu.pipeline_mode<synchronous>, transform_indices = @transform_2, window_bounds = array<i64: 1, 16>}, {pipeline_mode = #tpu.pipeline_mode<synchronous>, transform_indices = @transform_3, window_bounds = array<i64: 16, 128>}, {pipeline_mode = #tpu.pipeline_mode<synchronous>, transform_indices = @transform_4, window_bounds = array<i64: 1, 128>}, {pipeline_mode = #tpu.pipeline_mode<synchronous>, transform_indices = @transform_5, window_bounds = array<i64: 128, 128>}, {pipeline_mode = #tpu.pipeline_mode<synchronous>, transform_indices = @transform_6, window_bounds = array<i64: 1, 128>}, {pipeline_mode = #tpu.pipeline_mode<synchronous>, transform_indices = @transform_7, window_bounds = array<i64: 128, 128>}, {pipeline_mode = #tpu.pipeline_mode<synchronous>, transform_indices = @transform_8, window_bounds = array<i64: 1, 128>}, {pipeline_mode = #tpu.pipeline_mode<synchronous>, transform_indices = @transform_9, window_bounds = array<i64: 128, 4>}, {pipeline_mode = #tpu.pipeline_mode<synchronous>, transform_indices = @transform_10, window_bounds = array<i64: 1, 4>}, {transform_indices = @transform_11, window_bounds = array<i64: 8, 4>}]} {
    %c0_i32 = arith.constant 0 : i32
    %0 = arith.cmpi eq, %arg0, %c0_i32 : i32
    %1 = arith.extui %0 : i1 to i32
    %c0_i32_0 = arith.constant 0 : i32
    %2 = arith.cmpi ne, %1, %c0_i32_0 : i32
    scf.if %2 {
      %c0_29 = arith.constant 0 : index
      %c0_30 = arith.constant 0 : index
      %45 = vector.load %arg1[%c0_29, %c0_30] : memref<8x16xf32, #tpu.memory_space<vmem>>, vector<8x16xf32>
      %cst_31 = arith.constant dense<0.000000e+00> : vector<16xf32>
      %46 = vector.multi_reduction <add>, %45, %cst_31 [0] : vector<8x16xf32> to vector<16xf32>
      %47 = vector.shape_cast %46 : vector<16xf32> to vector<1x16xf32>
      %cst_32 = arith.constant 1.250000e-01 : f32
      %48 = vector.broadcast %cst_32 : f32 to vector<1x16xf32>
      %49 = arith.mulf %47, %48 : vector<1x16xf32>
      %50 = tpu.iota {dimensions = array<i32: 0>} : vector<8x16xi32>
      %c8_i32_33 = arith.constant 8 : i32
      %51 = vector.broadcast %c8_i32_33 : i32 to vector<8x16xi32>
      %52 = arith.cmpi slt, %50, %51 : vector<8x16xi32>
      %53 = vector.broadcast %49 : vector<1x16xf32> to vector<8x16xf32>
      %54 = arith.subf %45, %53 : vector<8x16xf32>
      %cst_34 = arith.constant 0.000000e+00 : f32
      %55 = vector.broadcast %cst_34 : f32 to vector<8x16xf32>
      %56 = arith.select %52, %54, %55 : vector<8x16xi1>, vector<8x16xf32>
      %57 = arith.mulf %56, %56 : vector<8x16xf32>
      %cst_35 = arith.constant dense<0.000000e+00> : vector<16xf32>
      %58 = vector.multi_reduction <add>, %57, %cst_35 [0] : vector<8x16xf32> to vector<16xf32>
      %59 = vector.shape_cast %58 : vector<16xf32> to vector<1x16xf32>
      %cst_36 = arith.constant 1.250000e-01 : f32
      %60 = vector.broadcast %cst_36 : f32 to vector<1x16xf32>
      %61 = arith.mulf %59, %60 : vector<1x16xf32>
      %c0_37 = arith.constant 0 : index
      %c0_38 = arith.constant 0 : index
      %62 = vector.load %arg2[%c0_37, %c0_38] : memref<1x16xf32, #tpu.memory_space<vmem>>, vector<1x16xf32>
      %cst_39 = arith.constant 9.99999974E-6 : f32
      %63 = vector.broadcast %cst_39 : f32 to vector<1x16xf32>
      %64 = arith.addf %61, %63 : vector<1x16xf32>
      %65 = math.rsqrt %64 : vector<1x16xf32>
      %66 = arith.mulf %62, %65 : vector<1x16xf32>
      %c0_40 = arith.constant 0 : index
      %c0_41 = arith.constant 0 : index
      %67 = vector.load %arg13[%c0_40, %c0_41] : memref<1x16xf32, #tpu.memory_space<vmem>>, vector<1x16xf32>
      tpu.vector_store %arg13[%c0_40, %c0_41], %66 {strides = array<i32>} : memref<1x16xf32, #tpu.memory_space<vmem>>, vector<1x16xf32>,
      %c0_42 = arith.constant 0 : index
      %c0_43 = arith.constant 0 : index
      %68 = vector.load %arg3[%c0_42, %c0_43] : memref<1x16xf32, #tpu.memory_space<vmem>>, vector<1x16xf32>
      %69 = arith.mulf %49, %66 : vector<1x16xf32>
      %70 = arith.subf %68, %69 : vector<1x16xf32>
      %c0_44 = arith.constant 0 : index
      %c0_45 = arith.constant 0 : index
      %71 = vector.load %arg14[%c0_44, %c0_45] : memref<1x16xf32, #tpu.memory_space<vmem>>, vector<1x16xf32>
      tpu.vector_store %arg14[%c0_44, %c0_45], %70 {strides = array<i32>} : memref<1x16xf32, #tpu.memory_space<vmem>>, vector<1x16xf32>,
    } else {
    }
    %c8_i32 = arith.constant 8 : i32
    %3 = arith.muli %arg0, %c8_i32 : i32
    %4 = tpu.assume_multiple %3, 8 : i32
    %5 = arith.index_cast %4 : i32 to index
    %c0 = arith.constant 0 : index
    %6 = vector.load %arg1[%5, %c0] : memref<8x16xf32, #tpu.memory_space<vmem>>, vector<8x16xf32>
    %c0_1 = arith.constant 0 : index
    %c0_2 = arith.constant 0 : index
    %7 = vector.load %arg13[%c0_1, %c0_2] : memref<1x16xf32, #tpu.memory_space<vmem>>, vector<1x16xf32>
    %8 = vector.broadcast %7 : vector<1x16xf32> to vector<8x16xf32>
    %9 = arith.mulf %6, %8 : vector<8x16xf32>
    %c0_3 = arith.constant 0 : index
    %c0_4 = arith.constant 0 : index
    %10 = vector.load %arg14[%c0_3, %c0_4] : memref<1x16xf32, #tpu.memory_space<vmem>>, vector<1x16xf32>
    %11 = vector.broadcast %10 : vector<1x16xf32> to vector<8x16xf32>
    %12 = arith.addf %9, %11 : vector<8x16xf32>
    %13 = arith.truncf %12 : vector<8x16xf32> to vector<8x16xbf16>
    %c0_5 = arith.constant 0 : index
    %c0_6 = arith.constant 0 : index
    %14 = vector.load %arg4[%c0_5, %c0_6] : memref<16x128xbf16, #tpu.memory_space<vmem>>, vector<16x128xbf16>
    %cst = arith.constant dense<0.000000e+00> : vector<8x128xf32>
    %15 = tpu.matmul %13, %14, %cst {dimension_numbers = #tpu.dot_dimension_numbers<[1], [0], [0], [1], [0, 0, 1, 1], [], []>} : vector<8x16xbf16>, vector<16x128xbf16>, vector<8x128xf32> -> vector<8x128xf32>
    %c0_7 = arith.constant 0 : index
    %c0_8 = arith.constant 0 : index
    %16 = vector.load %arg5[%c0_7, %c0_8] : memref<1x128xf32, #tpu.memory_space<vmem>>, vector<1x128xf32>
    %17 = vector.broadcast %16 : vector<1x128xf32> to vector<8x128xf32>
    %18 = arith.addf %15, %17 : vector<8x128xf32>
    %cst_9 = arith.constant 0.000000e+00 : f32
    %19 = vector.broadcast %cst_9 : f32 to vector<8x128xf32>
    %20 = arith.maximumf %18, %19 : vector<8x128xf32>
    %21 = arith.truncf %20 : vector<8x128xf32> to vector<8x128xbf16>
    %c0_10 = arith.constant 0 : index
    %c0_11 = arith.constant 0 : index
    %22 = vector.load %arg6[%c0_10, %c0_11] : memref<128x128xbf16, #tpu.memory_space<vmem>>, vector<128x128xbf16>
    %cst_12 = arith.constant dense<0.000000e+00> : vector<8x128xf32>
    %23 = tpu.matmul %21, %22, %cst_12 {dimension_numbers = #tpu.dot_dimension_numbers<[1], [0], [0], [1], [0, 0, 1, 1], [], []>} : vector<8x128xbf16>, vector<128x128xbf16>, vector<8x128xf32> -> vector<8x128xf32>
    %c0_13 = arith.constant 0 : index
    %c0_14 = arith.constant 0 : index
    %24 = vector.load %arg7[%c0_13, %c0_14] : memref<1x128xf32, #tpu.memory_space<vmem>>, vector<1x128xf32>
    %25 = vector.broadcast %24 : vector<1x128xf32> to vector<8x128xf32>
    %26 = arith.addf %23, %25 : vector<8x128xf32>
    %cst_15 = arith.constant 0.000000e+00 : f32
    %27 = vector.broadcast %cst_15 : f32 to vector<8x128xf32>
    %28 = arith.maximumf %26, %27 : vector<8x128xf32>
    %29 = arith.truncf %28 : vector<8x128xf32> to vector<8x128xbf16>
    %c0_16 = arith.constant 0 : index
    %c0_17 = arith.constant 0 : index
    %30 = vector.load %arg8[%c0_16, %c0_17] : memref<128x128xbf16, #tpu.memory_space<vmem>>, vector<128x128xbf16>
    %cst_18 = arith.constant dense<0.000000e+00> : vector<8x128xf32>
    %31 = tpu.matmul %29, %30, %cst_18 {dimension_numbers = #tpu.dot_dimension_numbers<[1], [0], [0], [1], [0, 0, 1, 1], [], []>} : vector<8x128xbf16>, vector<128x128xbf16>, vector<8x128xf32> -> vector<8x128xf32>
    %c0_19 = arith.constant 0 : index
    %c0_20 = arith.constant 0 : index
    %32 = vector.load %arg9[%c0_19, %c0_20] : memref<1x128xf32, #tpu.memory_space<vmem>>, vector<1x128xf32>
    %33 = vector.broadcast %32 : vector<1x128xf32> to vector<8x128xf32>
    %34 = arith.addf %31, %33 : vector<8x128xf32>
    %cst_21 = arith.constant 0.000000e+00 : f32
    %35 = vector.broadcast %cst_21 : f32 to vector<8x128xf32>
    %36 = arith.maximumf %34, %35 : vector<8x128xf32>
    %37 = arith.truncf %36 : vector<8x128xf32> to vector<8x128xbf16>
    %c0_22 = arith.constant 0 : index
    %c0_23 = arith.constant 0 : index
    %38 = vector.load %arg10[%c0_22, %c0_23] : memref<128x4xbf16, #tpu.memory_space<vmem>>, vector<128x4xbf16>
    %cst_24 = arith.constant dense<0.000000e+00> : vector<8x4xf32>
    %39 = tpu.matmul %37, %38, %cst_24 {dimension_numbers = #tpu.dot_dimension_numbers<[1], [0], [0], [1], [0, 0, 1, 1], [], []>} : vector<8x128xbf16>, vector<128x4xbf16>, vector<8x4xf32> -> vector<8x4xf32>
    %c0_25 = arith.constant 0 : index
    %c0_26 = arith.constant 0 : index
    %40 = vector.load %arg11[%c0_25, %c0_26] : memref<1x4xf32, #tpu.memory_space<vmem>>, vector<1x4xf32>
    %41 = vector.broadcast %40 : vector<1x4xf32> to vector<8x4xf32>
    %42 = arith.addf %39, %41 : vector<8x4xf32>
    %43 = math.tanh %42 : vector<8x4xf32>
    %c0_27 = arith.constant 0 : index
    %c0_28 = arith.constant 0 : index
    %44 = vector.load %arg12[%c0_27, %c0_28] : memref<8x4xf32, #tpu.memory_space<vmem>>, vector<8x4xf32>
    tpu.vector_store %arg12[%c0_27, %c0_28], %43 {strides = array<i32>} : memref<8x4xf32, #tpu.memory_space<vmem>>, vector<8x4xf32>,
    return
  }
  func.func @transform_0(%arg0: i32) -> (i32, i32) {
    %c0_i32 = arith.constant 0 : i32
    %c0_i32_0 = arith.constant 0 : i32
    %c0_i32_1 = arith.constant 0 : i32
    return %c0_i32, %c0_i32_0 : i32, i32
  }
  func.func @transform_1(%arg0: i32) -> (i32, i32) {
    %c0_i32 = arith.constant 0 : i32
    %c0_i32_0 = arith.constant 0 : i32
    %c0_i32_1 = arith.constant 0 : i32
    return %c0_i32, %c0_i32_0 : i32, i32
  }
  func.func @transform_2(%arg0: i32) -> (i32, i32) {
    %c0_i32 = arith.constant 0 : i32
    %c0_i32_0 = arith.constant 0 : i32
    %c0_i32_1 = arith.constant 0 : i32
    return %c0_i32, %c0_i32_0 : i32, i32
  }
  func.func @transform_3(%arg0: i32) -> (i32, i32) {
    %c0_i32 = arith.constant 0 : i32
    %c0_i32_0 = arith.constant 0 : i32
    %c0_i32_1 = arith.constant 0 : i32
    return %c0_i32, %c0_i32_0 : i32, i32
  }
  func.func @transform_4(%arg0: i32) -> (i32, i32) {
    %c0_i32 = arith.constant 0 : i32
    %c0_i32_0 = arith.constant 0 : i32
    %c0_i32_1 = arith.constant 0 : i32
    return %c0_i32, %c0_i32_0 : i32, i32
  }
  func.func @transform_5(%arg0: i32) -> (i32, i32) {
    %c0_i32 = arith.constant 0 : i32
    %c0_i32_0 = arith.constant 0 : i32
    %c0_i32_1 = arith.constant 0 : i32
    return %c0_i32, %c0_i32_0 : i32, i32
  }
  func.func @transform_6(%arg0: i32) -> (i32, i32) {
    %c0_i32 = arith.constant 0 : i32
    %c0_i32_0 = arith.constant 0 : i32
    %c0_i32_1 = arith.constant 0 : i32
    return %c0_i32, %c0_i32_0 : i32, i32
  }
  func.func @transform_7(%arg0: i32) -> (i32, i32) {
    %c0_i32 = arith.constant 0 : i32
    %c0_i32_0 = arith.constant 0 : i32
    %c0_i32_1 = arith.constant 0 : i32
    return %c0_i32, %c0_i32_0 : i32, i32
  }
  func.func @transform_8(%arg0: i32) -> (i32, i32) {
    %c0_i32 = arith.constant 0 : i32
    %c0_i32_0 = arith.constant 0 : i32
    %c0_i32_1 = arith.constant 0 : i32
    return %c0_i32, %c0_i32_0 : i32, i32
  }
  func.func @transform_9(%arg0: i32) -> (i32, i32) {
    %c0_i32 = arith.constant 0 : i32
    %c0_i32_0 = arith.constant 0 : i32
    %c0_i32_1 = arith.constant 0 : i32
    return %c0_i32, %c0_i32_0 : i32, i32
  }
  func.func @transform_10(%arg0: i32) -> (i32, i32) {
    %c0_i32 = arith.constant 0 : i32
    %c0_i32_0 = arith.constant 0 : i32
    %c0_i32_1 = arith.constant 0 : i32
    return %c0_i32, %c0_i32_0 : i32, i32
  }
  func.func @transform_11(%arg0: i32) -> (i32, i32) {
    %c0_i32 = arith.constant 0 : i32
    %c0_i32_0 = arith.constant 0 : i32
    return %arg0, %c0_i32 : i32, i32
  }
}

</mosaic_0001>

<bundles_post_ra>
// kernel: tpu_custom_call.1
= control target key start
LH: loop header
LB: loop body
LE: loop exit
PB: predicated region body
PF: predicated region fallthrough
CT: control target
= control target key end

     0   :  { %16 = vsyncpa [#allocation5], 0  ;;  %s795_s0 = inlined_call_operand.hbm [shape: f32[8,16], index: 0, kind: input, shape index: {}]   ;;  %s796_s1 = inlined_call_operand.vmem [shape: f32[1,16], index: 1, kind: input, shape index: {}]   ;;  %s797_s2 = inlined_call_operand.vmem [shape: f32[1,16], index: 2, kind: input, shape index: {}]   ;;  %s798_s3 = inlined_call_operand.hbm [shape: bf16[16,128], index: 3, kind: input, shape index: {}]   ;;  %s799_s4 = inlined_call_operand.vmem [shape: f32[1,128], index: 4, kind: input, shape index: {}]   ;;  %s800_s5 = inlined_call_operand.vmem [shape: bf16[128,128], index: 5, kind: input, shape index: {}]   ;;  %s801_s6 = inlined_call_operand.vmem [shape: f32[1,128], index: 6, kind: input, shape index: {}]   ;;  %s802_s7 = inlined_call_operand.hbm [shape: bf16[128,128], index: 7, kind: input, shape index: {}]   ;;  %s803_s8 = inlined_call_operand.vmem [shape: f32[1,128], index: 8, kind: input, shape index: {}]   ;;  %s804_s9 = inlined_call_operand.vmem [shape: bf16[128,4], index: 9, kind: input, shape index: {}]   ;;  %s805_s10 = inlined_call_operand.vmem [shape: f32[1,4], index: 10, kind: input, shape index: {}]   ;;  %s806_s11 = inlined_call_operand.vmem [shape: f32[8,4], index: 11, kind: output, shape index: {}]  }
   0x1   :  { %17 = vsyncpa [#allocation7], 0  ;;  %s37_s19 = sshll.u32 %s798_s3, 4  ;;  %s649_s20 = smov [#allocation6]   ;;  %s38_s19 = int_to_ptr.hbm [resolvable:$true] %s37_s19 }
   0x2   :  { %s39_s21 = sshll.u32 %s649_s20, 4  ;;  %s23_s24 = sshll.u32 %s795_s0, 4  ;;  %s40_s21 = int_to_ptr.vmem [resolvable:$true] %s39_s21  ;;  %s24_s24 = int_to_ptr.hbm [resolvable:$true] %s23_s24 }
   0x3   :  { %s650_s25 = smov 64   ;;  %s651_s26 = smov 4  }
   0x4   :  { %45 = dma.hbm_to_vmem [thread:$0]  %s38_s19, 128, %s40_s21, [#allocation7], %s650_s25, %s650_s25, %s651_s26  }
   0x5   :  { %s652_s27 = smov [#allocation4]   ;;  %s56_s12 = sshll.u32 %s802_s7, 4  ;;  %s57_s12 = int_to_ptr.hbm [resolvable:$true] %s56_s12 }
   0x6   :  { %s25_s28 = sshll.u32 %s652_s27, 4  ;;  %s653_s3 = smov [#allocation8]   ;;  %s26_s28 = int_to_ptr.vmem [resolvable:$true] %s25_s28 }
   0x7   :  { %28 = dma.hbm_to_vmem [thread:$0]  %s24_s24, 128, %s26_s28, [#allocation5]  }
   0x8   :  { %s58_s13 = sshll.u32 %s653_s3, 4  ;;  %s59_s13 = int_to_ptr.vmem [resolvable:$true] %s58_s13 }
   0x9   :  { %64 = dma.hbm_to_vmem [thread:$0]  %s57_s12, 1024, %s59_s13, [#allocation7], %s650_s25, %s650_s25, %s651_s26  }
   0xa   :  { %645 = dma.done.wait [#allocation5], 128  }
   0xb   :  { %646 = vsyncadd [#allocation5], 4294967168 }
   0xc   :  { %647 = dma.done.wait [#allocation7], 1152  }
   0xd   :  { %648 = vsyncadd [#allocation7], 4294966144  ;;  %vm89_vm0 = vcmask 130048   ;;  %v533_v0 = vld [vmem:[#allocation6] sm:$0xff]  ;;  %v88_v1 = vld [vmem:[#allocation4] sm:$0xff]  ;;  %vm125_vm4 = vcmask 122880  }
   0xe   :  { %v90_v2 = vsel %vm89_vm0, %v88_v1, 0.0  ;;  %168 = vmatpush.bf16.msra.mxu0 %v533_v0  ;;  %v541_v21 = vld [vmem:[%s800_s5 + $0x38] sm:$0xff]  ;;  %v540_v24 = vld [vmem:[%s800_s5 + $0x30] sm:$0xff]  ;;  %v539_v27 = vld [vmem:[%s800_s5 + $0x28] sm:$0xff]  ;;  %vm424_vm5 = vcmask 31744  }
   0xf   :  { %v91_v3 = vrot.slane %v90_v2, 4  ;;  %244 = vmatpush.bf16.msra.mxu1 %v541_v21  ;;  %v112_v29 = vld [vmem:[%s796_s1] sm:$0x1]  ;;  %v537_v35 = vld [vmem:[%s800_s5 + $0x18] sm:$0xff]  ;;  %v536_v38 = vld [vmem:[%s800_s5 + $0x10] sm:$0xff] }
  0x10   :  { %v538_v31 = vld [vmem:[%s800_s5 + $0x20] sm:$0xff]  ;;  %v535_v44 = vld [vmem:[%s800_s5 + $0x8] sm:$0xff]  ;;  %v546_v49 = vld [vmem:[#allocation8 + $0x20] sm:$0xff] }
  0x11   :  { %v92_v4 = vadd.f32 %v91_v3, %v90_v2  ;;  %v127_v34 = vld [vmem:[%s797_s2] sm:$0x1]  ;;  %v549_v46 = vld [vmem:[#allocation8 + $0x38] sm:$0xff]  ;;  %v548_v47 = vld [vmem:[#allocation8 + $0x30] sm:$0xff] }
  0x12   :  { %v534_v45 = vld [vmem:[%s800_s5] sm:$0xff]  ;;  %327 = vmatpush.bf16.msra.mxu2 %v549_v46  ;;  %v545_v50 = vld [vmem:[#allocation8 + $0x18] sm:$0xff]  ;;  %v542_v59 = vld [vmem:[#allocation8] sm:$0xff] }
  0x13   :  { %v93_v5 = vrot.slane %v92_v4, 2  ;;  %245 = vmatpush.bf16.msra.mxu1 %v540_v24  ;;  %v547_v48 = vld [vmem:[#allocation8 + $0x28] sm:$0xff]  ;;  %v544_v51 = vld [vmem:[#allocation8 + $0x10] sm:$0xff]  ;;  %v556_v61 = vld [vmem:[%s804_s9 + $0x30] sm:$0xff] }
  0x14   :  { %v565_v52 = vld [vmem:[%s799_s4] ss:$0 sm:$0xff]  ;;  %v557_v60 = vld [vmem:[%s804_s9 + $0x38] sm:$0xff]  ;;  %v555_v62 = vld [vmem:[%s804_s9 + $0x28] sm:$0xff] }
  0x15   :  { %v94_v6 = vadd.f32 %v93_v5, %v92_v4  ;;  %v543_v58 = vld [vmem:[#allocation8 + $0x8] sm:$0xff]  ;;  %410 = vmatpush.bf16.msra.mxu3 %v557_v60 }
  0x16   :  { %328 = vmatpush.bf16.msra.mxu2 %v548_v47  ;;  %v554_v63 = vld [vmem:[%s804_s9 + $0x20] sm:$0xff]  ;;  %v553_v0 = vld [vmem:[%s804_s9 + $0x18] sm:$0xff] }
  0x17   :  { %v95_v7 = vrot.slane %v94_v6, 1  ;;  %246 = vmatpush.bf16.msra.mxu1 %v539_v27  ;;  %v566_v2 = vld [vmem:[%s801_s6] ss:$0 sm:$0xff] }
  0x19   :  { %v96_v8 = vadd.f32 %v95_v7, %v94_v6  ;;  %411 = vmatpush.bf16.msra.mxu3 %v556_v61 }
  0x1a   :  { %329 = vmatpush.bf16.msra.mxu2 %v547_v48 }
  0x1b   :  { %v97_v9 = vmul.f32 0.125, %v96_v8  ;;  %247 = vmatpush.bf16.msra.mxu1 %v538_v31  ;;  %v551_v8 = vld [vmem:[%s804_s9 + $0x8] sm:$0xff] }
  0x1d   :  { %v101_v10 = vsub.f32 %v88_v1, %v97_v9  ;;  %412 = vmatpush.bf16.msra.mxu3 %v555_v62 }
  0x1e   :  { %330 = vmatpush.bf16.msra.mxu2 %v546_v49 }
  0x1f   :  { %v103_v11 = vmul.f32 %v101_v10, %v101_v10  ;;  %248 = vmatpush.bf16.msra.mxu1 %v537_v35  ;;  %v567_v10 = vld [vmem:[%s803_s8] ss:$0 sm:$0xff] }
  0x21   :  { %v104_v12 = vsel %vm89_vm0, %v103_v11, 0.0  ;;  %413 = vmatpush.bf16.msra.mxu3 %v554_v63 }
  0x22   :  { %v105_v13 = vrot.slane %v104_v12, 4  ;;  %331 = vmatpush.bf16.msra.mxu2 %v545_v50 }
  0x23   :  { %249 = vmatpush.bf16.msra.mxu1 %v536_v38 }
  0x24   :  { %v106_v14 = vadd.f32 %v105_v13, %v104_v12 }
  0x25   :  { %414 = vmatpush.bf16.msra.mxu3 %v553_v0 }
  0x26   :  { %v107_v15 = vrot.slane %v106_v14, 2  ;;  %332 = vmatpush.bf16.msra.mxu2 %v544_v51 }
  0x27   :  { %250 = vmatpush.bf16.msra.mxu1 %v535_v44 }
  0x28   :  { %v108_v16 = vadd.f32 %v107_v15, %v106_v14 }
  0x2a   :  { %v109_v17 = vrot.slane %v108_v16, 1  ;;  %333 = vmatpush.bf16.msra.mxu2 %v543_v58 }
  0x2b   :  { %251 = vmatpush.bf16.msra.mxu1 %v534_v45 }
  0x2c   :  { %v110_v18 = vadd.f32 %v109_v17, %v108_v16  ;;  %v568_v16 = vld [vmem:[%s805_s10] ss:$0 sm:$0xff] }
  0x2e   :  { %v111_v19 = vmul.f32 0.125, %v110_v18  ;;  %334 = vmatpush.bf16.msra.mxu2 %v542_v59 }
  0x30   :  { %v113_v20 = vadd.f32 1e-05, %v111_v19 }
  0x32   :  { %569 = vrsqrt.f32 %v113_v20  ;;  %vm120_vm1 = vweird.f32 %v113_v20 }
  0x38   :  { %v570_v22 = vpop.eup %569 }
  0x39   :  { %v115_v23 = vmul.f32 %v570_v22, %v113_v20  ;;  %vm121_vm2 = vweird.f32 %v570_v22 }
  0x3a   :  { %vm122_vm3 = vmor %vm120_vm1, %vm121_vm2 }
  0x3b   :  { %v116_v25 = vmul.f32 %v570_v22, %v115_v23 }
  0x3d   :  { %v117_v26 = vmul.f32 0.5, %v116_v25 }
  0x3f   :  { %v118_v28 = vsub.f32 1.5, %v117_v26 }
  0x41   :  { %v119_v30 = vmul.f32 %v570_v22, %v118_v28 }
  0x43   :  { %v123_v32 = vsel %vm122_vm3, %v570_v22, %v119_v30 }
  0x44   :  { %v124_v33 = vmul.f32 %v123_v32, %v112_v29 }
  0x46   :  { %126 = vst.msk [vmem:[#allocation2] sm:$0x1] %vm125_vm4, %v124_v33  ;;  %v128_v36 = vmul.f32 %v124_v33, %v97_v9  ;;  %v550_v9 = vld [vmem:[%s804_s9] sm:$0xff] }
  0x48   :  { %v129_v37 = vsub.f32 %v127_v34, %v128_v36 }
  0x4a   :  { %130 = vst.msk [vmem:[#allocation3] sm:$0x1] %vm125_vm4, %v129_v37 }
  0x4d   :  { %v563_v39 = vld [vmem:[#allocation2] ss:$0 sm:$0xff] }
  0x4e   :  { %v138_v40 = vmul.f32 %v563_v39, %v88_v1  ;;  %v552_v1 = vld [vmem:[%s804_s9 + $0x10] sm:$0xff] }
  0x4f   :  { %415 = vmatpush.bf16.msra.mxu3 %v552_v1 }
  0x51   :  { %v564_v41 = vld [vmem:[#allocation3] ss:$0 sm:$0xff] }
  0x52   :  { %v143_v42 = vadd.f32 %v564_v41, %v138_v40 }
  0x53   :  { %416 = vmatpush.bf16.msra.mxu3 %v551_v8 }
  0x54   :  { %v144_v43 = vpack.c.bf16 %v143_v42, %v143_v42 }
  0x56   :  { %436 = vmatmul.msk.bf16.vlgmr.msra.gmra.mxu0 %vm89_vm0, %v144_v43 }
  0x57   :  { %417 = vmatpush.bf16.msra.mxu3 %v550_v9 }
  0xd3   :  { %v170_v53 = vpop.f32.mrf.mxu0 }
  0xd4   :  { %v171_v54 = vadd.f32 %v565_v52, %v170_v53 }
  0xd6   :  { %v174_v55 = vmax.f32 %v171_v54, 0.0 }
  0xd8   :  { %v175_v56 = vpack.c.bf16 %v174_v55, %v174_v55 }
  0xda   :  { %252 = vmatmul.bf16.vlgmr.msra.gmra.mxu1 %v175_v56 }
  0xdb   :  { %v172_v57 = vpop.f32.mrf.mxu0 }
 0x157   :  { %v253_v3 = vpop.f32.mrf.mxu1 }
 0x158   :  { %v254_v4 = vadd.f32 %v566_v2, %v253_v3 }
 0x15a   :  { %v257_v5 = vmax.f32 %v254_v4, 0.0 }
 0x15c   :  { %v258_v6 = vpack.c.bf16 %v257_v5, %v257_v5 }
 0x15e   :  { %335 = vmatmul.bf16.vlgmr.msra.gmra.mxu2 %v258_v6 }
 0x15f   :  { %v255_v7 = vpop.f32.mrf.mxu1 }
 0x1e1   :  { %v336_v11 = vpop.f32.mrf.mxu2 }
 0x1e2   :  { %v337_v12 = vadd.f32 %v567_v10, %v336_v11 }
 0x1e4   :  { %v340_v13 = vmax.f32 %v337_v12, 0.0 }
 0x1e6   :  { %v341_v14 = vpack.c.bf16 %v340_v13, %v340_v13 }
 0x1e8   :  { %418 = vmatmul.bf16.vlgmr.msra.gmra.mxu3 %v341_v14 }
 0x1e9   :  { %v338_v15 = vpop.f32.mrf.mxu2 }
 0x26b   :  { %v419_v17 = vpop.f32.mrf.mxu3 }
 0x26c   :  { %v420_v18 = vadd.f32 %v568_v16, %v419_v17 }
 0x26e   :  { %571 = vtanh.f32 %v420_v18 }
 0x273   :  { %v421_v19 = vpop.f32.mrf.mxu3 }
 0x274   :  { %v572_v20 = vpop.eup %571 }
 0x275   :  { %425 = vst.msk [vmem:[%s806_s11] sm:$0xff] %vm424_vm5, %v572_v20 }
 0x276   :  { %430 = vsyncpa [#allocation5], 1 }
 0x277   :  { %431 = vsyncpa [#allocation7], 1 }

</bundles_post_ra>
